<compile_context>
chip_gen: v6e
topology: v6e:2x2x1
jax: 0.10.0
libtpu: 0.0.40
codegen_flags: <defaults>
</compile_context>

<pallas_src>
import jax
import jax.numpy as jnp
from jax.experimental import pallas as pl
from jax.experimental.pallas import tpu as pltpu


def _round_up(x, m):
    return (x + m - 1) // m * m


def _conv_silu_kernel(x_ref, w_ref, b_ref, o_ref):
    # x_ref: (1, TM, 9*Cin) bf16   packed conv patches for TM output pixels
    # w_ref: (9*Cin, TN)    bf16   packed weights for one Cout tile
    # b_ref: (1, TN)        f32
    # o_ref: (1, TM, TN)    bf16
    acc = jnp.dot(x_ref[0], w_ref[...], preferred_element_type=jnp.float32)
    acc = acc + b_ref[...]                                   # bias (f32)
    sig = pl.reciprocal(1.0 + jnp.exp(-acc), approx=True)    # sigmoid on the EUP
    o_ref[0, :, :] = (acc * sig).astype(o_ref.dtype)         # SiLU, lane-dense store


def _tile_n_for_device(cout_pad128):
    """256-wide output tile on 256-wide-MXU generations (v6e/v7x), else 128."""
    if cout_pad128 < 256:
        return 128
    try:
        kind = jax.devices()[0].device_kind.lower()
    except Exception:
        return 128
    if any(v in kind for v in ("v2", "v3", "v4", "v5")):
        return 128
    return 256


def _vmem_limit_bytes(blk_bytes):
    try:
        cap = int(pltpu.get_tpu_info().vmem_capacity_bytes)
    except Exception:
        cap = 64 * 1024 * 1024                # v7x-safe fallback
    cap = cap * 7 // 8                        # headroom for Mosaic scratch
    want = max(3 * blk_bytes, 32 * 1024 * 1024)
    return int(min(want, cap))


def downsample_conv_layer(x_nchw, weight, bias, *, compute_dtype=jnp.bfloat16,
                          tile_m=512):
    """Conv2d(k=3, s=2, p=1) + SiLU. x_nchw: (N, Cin, H, W); weight: (Cout, Cin, 3, 3)."""
    N, Cin, H, W = x_nchw.shape
    Cout = weight.shape[0]
    Ho = (H - 1) // 2 + 1
    Wo = (W - 1) // 2 + 1
    K9 = 9 * Cin
    out_dtype = x_nchw.dtype

    tile_n = _tile_n_for_device(_round_up(Cout, 128))
    Cout_pad = _round_up(Cout, tile_n)

    M = Ho * Wo
    TM = min(_round_up(tile_m, 16), _round_up(M, 16))   # multiple of 16 (bf16 sublane)
    M_pad = _round_up(M, TM)

    # ---- layout plumbing: NHWC, zero-pad, pack the 3x3 taps along channels ----
    x = jnp.transpose(x_nchw, (0, 2, 3, 1)).astype(compute_dtype)        # NHWC bf16
    xp = jnp.pad(x, ((0, 0), (1, 2 * Ho - H), (1, 2 * Wo - W), (0, 0)))  # (N,2Ho+1,2Wo+1,Cin)
    taps = [xp[:, kh:kh + 2 * Ho - 1:2, kw:kw + 2 * Wo - 1:2, :]         # (N,Ho,Wo,Cin)
            for kh in range(3) for kw in range(3)]
    patches = jnp.concatenate(taps, axis=-1).reshape(N, M, K9)           # (N, M, 9*Cin)
    patches = jnp.pad(patches, ((0, 0), (0, M_pad - M), (0, 0)))

    # weights: (Cout, Cin, 3, 3) -> (3, 3, Cin, Cout) -> (9*Cin, Cout_pad), bf16
    w = jnp.transpose(weight, (2, 3, 1, 0)).reshape(K9, Cout)
    w = jnp.pad(w, ((0, 0), (0, Cout_pad - Cout))).astype(compute_dtype)
    b = jnp.pad(bias.astype(jnp.float32), (0, Cout_pad - Cout)).reshape(1, Cout_pad)

    # per-step VMEM footprint: double-buffered IO blocks + f32 epilogue temps
    isz = jnp.dtype(compute_dtype).itemsize
    blk_bytes = (2 * (TM * K9 * isz + K9 * tile_n * isz + tile_n * 4
                      + TM * tile_n * isz)
                 + 2 * TM * tile_n * 4)

    out = pl.pallas_call(
        _conv_silu_kernel,
        out_shape=jax.ShapeDtypeStruct((N, M_pad, Cout_pad), compute_dtype),
        grid=(N, M_pad // TM, Cout_pad // tile_n),
        in_specs=[
            # patch block depends only on (n, mi): re-used across the Cout axis
            pl.BlockSpec((1, TM, K9), lambda n, mi, j: (n, mi, 0)),
            pl.BlockSpec((K9, tile_n), lambda n, mi, j: (0, j)),
            pl.BlockSpec((1, tile_n), lambda n, mi, j: (0, j)),
        ],
        out_specs=pl.BlockSpec((1, TM, tile_n), lambda n, mi, j: (n, mi, j)),
        compiler_params=pltpu.CompilerParams(
            dimension_semantics=("parallel", "parallel", "parallel"),
            vmem_limit_bytes=_vmem_limit_bytes(blk_bytes)),
    )(patches, w, b)

    # drop M / Cout padding, back to NCHW in the caller's dtype
    out = out[:, :M, :Cout].reshape(N, Ho, Wo, Cout)
    return jnp.transpose(out, (0, 3, 1, 2)).astype(out_dtype)


def _reference(x_nchw, weight, bias):
    y = jax.lax.conv_general_dilated(
        x_nchw, weight, window_strides=(2, 2),
        padding=((1, 1), (1, 1)),
        dimension_numbers=("NCHW", "OIHW", "NCHW"))
    y = y + bias[None, :, None, None]
    return y * jax.nn.sigmoid(y)


if __name__ == "__main__":
    key = jax.random.PRNGKey(0)
    kx, kw_, kb = jax.random.split(key, 3)

    N, Cin, H, W = 2, 4, 16, 16
    Cout = 8

    x = jax.random.normal(kx, (N, Cin, H, W), dtype=jnp.float32)
    # deterministic Conv2d-style init (uniform in +/- 1/sqrt(fan_in))
    fan_in = Cin * 3 * 3
    bound = 1.0 / (fan_in ** 0.5)
    weight = jax.random.uniform(kw_, (Cout, Cin, 3, 3), jnp.float32, -bound, bound)
    bias = jax.random.uniform(kb, (Cout,), jnp.float32, -bound, bound)

    fn = jax.jit(downsample_conv_layer)
    out = jax.block_until_ready(fn(x, weight, bias))

    ref = _reference(x, weight, bias)
    assert out.shape == (N, Cout, H // 2, W // 2), out.shape
    max_err = float(jnp.max(jnp.abs(out - ref)))
    # bf16 operands / approx-reciprocal sigmoid => small relative error vs f32 ref
    assert jnp.allclose(out, ref, atol=3e-2, rtol=3e-2), (
        f"mismatch vs reference conv, max|err|={max_err}")

    print("KERNEL_OK")
</pallas_src>

<mosaic_0001>
module attributes {stable_mosaic.version = 11 : i64} {
  func.func @_conv_silu_kernel(%arg0: i32, %arg1: i32, %arg2: i32, %arg3: memref<1x64x36xbf16, #tpu.memory_space<vmem>>, %arg4: memref<36x128xbf16, #tpu.memory_space<vmem>>, %arg5: memref<1x128xf32, #tpu.memory_space<vmem>>, %arg6: memref<1x64x128xbf16, #tpu.memory_space<vmem>>) attributes {dimension_semantics = [#tpu.dimension_semantics<parallel>, #tpu.dimension_semantics<parallel>, #tpu.dimension_semantics<parallel>], iteration_bounds = array<i64: 2, 1, 1>, scalar_prefetch = 0 : i64, scratch_operands = 0 : i64, tpu.core_type = #tpu.core_type<tc>, window_params = [{transform_indices = @transform_0, window_bounds = array<i64: 1, 64, 36>}, {transform_indices = @transform_1, window_bounds = array<i64: 36, 128>}, {transform_indices = @transform_2, window_bounds = array<i64: 1, 128>}, {transform_indices = @transform_3, window_bounds = array<i64: 1, 64, 128>}]} {
    %c0 = arith.constant 0 : index
    %c0_0 = arith.constant 0 : index
    %c0_1 = arith.constant 0 : index
    %0 = vector.load %arg3[%c0, %c0_0, %c0_1] : memref<1x64x36xbf16, #tpu.memory_space<vmem>>, vector<1x64x36xbf16>
    %1 = vector.shape_cast %0 : vector<1x64x36xbf16> to vector<64x36xbf16>
    %c0_2 = arith.constant 0 : index
    %c0_3 = arith.constant 0 : index
    %2 = vector.load %arg4[%c0_2, %c0_3] : memref<36x128xbf16, #tpu.memory_space<vmem>>, vector<36x128xbf16>
    %cst = arith.constant dense<0.000000e+00> : vector<64x128xf32>
    %3 = tpu.matmul %1, %2, %cst {dimension_numbers = #tpu.dot_dimension_numbers<[1], [0], [0], [1], [0, 0, 1, 1], [], []>} : vector<64x36xbf16>, vector<36x128xbf16>, vector<64x128xf32> -> vector<64x128xf32>
    %c0_4 = arith.constant 0 : index
    %c0_5 = arith.constant 0 : index
    %4 = vector.load %arg5[%c0_4, %c0_5] : memref<1x128xf32, #tpu.memory_space<vmem>>, vector<1x128xf32>
    %5 = vector.broadcast %4 : vector<1x128xf32> to vector<64x128xf32>
    %6 = arith.addf %3, %5 : vector<64x128xf32>
    %cst_6 = arith.constant 0.000000e+00 : f32
    %7 = vector.broadcast %cst_6 : f32 to vector<64x128xf32>
    %8 = arith.subf %7, %6 : vector<64x128xf32>
    %9 = math.exp %8 : vector<64x128xf32>
    %cst_7 = arith.constant 1.000000e+00 : f32
    %10 = vector.broadcast %cst_7 : f32 to vector<64x128xf32>
    %11 = arith.addf %10, %9 : vector<64x128xf32>
    %12 = tpu.reciprocal %11 {approx = true} : vector<64x128xf32> -> vector<64x128xf32>
    %13 = arith.mulf %6, %12 : vector<64x128xf32>
    %14 = arith.truncf %13 : vector<64x128xf32> to vector<64x128xbf16>
    %c0_8 = arith.constant 0 : index
    %c0_9 = arith.constant 0 : index
    %c0_10 = arith.constant 0 : index
    %15 = vector.load %arg6[%c0_8, %c0_9, %c0_10] : memref<1x64x128xbf16, #tpu.memory_space<vmem>>, vector<1x64x128xbf16>
    %16 = vector.shape_cast %15 : vector<1x64x128xbf16> to vector<64x128xbf16>
    %17 = vector.shape_cast %14 : vector<64x128xbf16> to vector<1x64x128xbf16>
    tpu.vector_store %arg6[%c0_8, %c0_9, %c0_10], %17 {strides = array<i32>} : memref<1x64x128xbf16, #tpu.memory_space<vmem>>, vector<1x64x128xbf16>,
    return
  }
  func.func @transform_0(%arg0: i32, %arg1: i32, %arg2: i32) -> (i32, i32, i32) {
    %c0_i32 = arith.constant 0 : i32
    %c0_i32_0 = arith.constant 0 : i32
    return %arg0, %arg1, %c0_i32 : i32, i32, i32
  }
  func.func @transform_1(%arg0: i32, %arg1: i32, %arg2: i32) -> (i32, i32) {
    %c0_i32 = arith.constant 0 : i32
    %c0_i32_0 = arith.constant 0 : i32
    return %c0_i32, %arg2 : i32, i32
  }
  func.func @transform_2(%arg0: i32, %arg1: i32, %arg2: i32) -> (i32, i32) {
    %c0_i32 = arith.constant 0 : i32
    %c0_i32_0 = arith.constant 0 : i32
    return %c0_i32, %arg2 : i32, i32
  }
  func.func @transform_3(%arg0: i32, %arg1: i32, %arg2: i32) -> (i32, i32, i32) {
    %c0_i32 = arith.constant 0 : i32
    return %arg0, %arg1, %arg2 : i32, i32, i32
  }
}

</mosaic_0001>

<bundles_post_ra>
// kernel: downsample_conv_layer.1
= control target key start
LH: loop header
LB: loop body
LE: loop exit
PB: predicated region body
PF: predicated region fallthrough
CT: control target
= control target key end

     0   :  { %s811_s12 = smov 0   ;;  %s813_s13 = smov 0   ;;  %s879_s0 = inlined_call_operand.vmem [shape: bf16[2,64,36], index: 0, kind: input, shape index: {}]   ;;  %s880_s1 = inlined_call_operand.vmem [shape: bf16[36,128], index: 1, kind: input, shape index: {}]   ;;  %s881_s2 = inlined_call_operand.vmem [shape: f32[1,128], index: 2, kind: input, shape index: {}]   ;;  %s882_s3 = inlined_call_operand.vmem [shape: bf16[2,64,128], index: 3, kind: output, shape index: {}]  }
   0x1   :  { %s815_s14 = smov 0  }
   0x2 LB: > { %s32_s15 = sadd.s32 1, %s785_s13  ;;  %p615_p0 = scmp.ge.s32.totalorder %s789_s14, 1  ;;  %s789_s14 = sphi %s815_s14, %s13_s14   ;;  %s785_s13 = sphi %s813_s13, %s884_s13   ;;  %s781_s12 = sphi %s811_s12, %s883_s12  }
   0x3   : > { %p34_p1 = scmp.ge.s32.totalorder %s32_s15, 2  ;;  %p184_p2 = scmp.lt.s32.totalorder %s789_s14, 3 }
   0x5   : > { %s886_s15 = smov (%p34_p1, %s32_s15), 0  ;;  %p185_p3 = pnand %p615_p0, %p184_p2 }
   0x6   : > { %p227_p4 = scmp.lt.s32.totalorder (!%p185_p3), %s781_s12, 1 }
   0x7   : > { %188 = sbr.rel (%p185_p3) target bundleno = 267 (0x10b), region = 32 }
   0xc   : > { %v728_v0 = vld [vmem:[%s880_s1 + $0x10] ss:$0 sps:$4 sm:$0x33]   ;;  %vm325_vm0 = vcmask 1041408   ;;  %v729_v1 = vld [vmem:[%s880_s1 + $0x8] sm:$0xff]   ;;  %s888_s12 = smov (!%p227_p4, %s781_s12), 1 }
   0xd   : > { %702 = vmatprep.subr.msk.bf16.mxu0 %vm325_vm0, %v728_v0  ;;  %703 = vmatprep.subr.msk.bf16.mxu1 %vm325_vm0, %v728_v0  ;;  %v327_v2 = vsel %vm325_vm0, %v728_v0, 0  ;;  %v730_v3 = vld [vmem:[%s880_s1] sm:$0xff]   ;;  %s642_s22 = sshll.u32 %s888_s12, 5  ;;  %vm312_vm1 = vcmask 293888  }
   0xe   : > { %683 = vmatpush3.bf16.msra.mxu0 %v327_v2  ;;  %699 = vmatpush3.bf16.msra.mxu1 %v327_v2  ;;  %s234_s25 = scalar_lea.vmem %s879_s0, %s642_s22  ;;  %v620_v8 = vld [vmem:[%s881_s2] ss:$0 sm:$0xff]  ;;  %s254_s30 = scalar_lea.vmem %s882_s3, %s642_s22 }
   0xf   : > { %684 = vmatprep.subr.bf16.mxu0 %v729_v1  ;;  %697 = vmatprep.subr.bf16.mxu1 %v729_v1  ;;  %v731_v4 = vld [vmem:[%s234_s25] sm:$0xff]   ;;  %v732_v5 = vld [vmem:[%s234_s25 + $0x10] sm:$0xff]   ;;  %v733_v6 = vld [vmem:[%s234_s25 + $0x8] sm:$0xff]  }
  0x10   : > { %688 = vmatprep.mubr.msk.bf16.mxu0 %vm312_vm1, %v731_v4  ;;  %692 = vmatprep.mubr.msk.bf16.mxu1 %vm312_vm1, %v732_v5  ;;  %v734_v7 = vld [vmem:[%s234_s25 + $0x18] sm:$0xff]  }
  0x12   : > { %685 = vmatpush3.bf16.msra.mxu0 %v729_v1  ;;  %700 = vmatpush3.bf16.msra.mxu1 %v729_v1 }
  0x13   : > { %686 = vmatprep.subr.bf16.mxu0 %v730_v3  ;;  %698 = vmatprep.subr.bf16.mxu1 %v730_v3 }
  0x16   : > { %687 = vmatpush3.bf16.msra.mxu0 %v730_v3  ;;  %701 = vmatpush3.bf16.msra.mxu1 %v730_v3 }
  0x19   : > { %689 = vmatmul.mubr.msk.bf16.vlgmr.msra.gmra.mxu0 %vm312_vm1, %v733_v6  ;;  %693 = vmatmul.mubr.msk.bf16.vlgmr.msra.gmra.mxu1 %vm312_vm1, %v734_v7 }
  0xd9   : > { %v690_v9 = vpop.f32.mrf.mxu0  ;;  %v694_v10 = vpop.f32.mrf.mxu1 }
  0xda   : > { %v849_v11 = vadd.f32 %v690_v9, %v620_v8  ;;  %v851_v12 = vadd.f32 %v694_v10, %v620_v8 }
  0xdb   : > { %v363_v13 = vpop.f32.mrf.mxu0  ;;  %v379_v14 = vpop.f32.mrf.mxu1 }
  0xdc   : > { %v396_v15 = vsub.f32 0.0, %v849_v11  ;;  %v400_v16 = vsub.f32 0.0, %v851_v12  ;;  %v855_v17 = vadd.f32 %v620_v8, %v363_v13  ;;  %v857_v18 = vadd.f32 %v620_v8, %v379_v14 }
  0xdd   : > { %v691_v19 = vpop.f32.mrf.mxu0  ;;  %v695_v20 = vpop.f32.mrf.mxu1 }
  0xde   : > { %v406_v21 = vmul.f32 1.442695, %v396_v15  ;;  %v414_v22 = vmul.f32 1.442695, %v400_v16  ;;  %v394_v23 = vsub.f32 0.0, %v855_v17  ;;  %v398_v24 = vsub.f32 0.0, %v857_v18 }
  0xdf   : > { %v375_v25 = vadd.f32 %v691_v19, %v620_v8  ;;  %v391_v26 = vadd.f32 %v695_v20, %v620_v8  ;;  %v366_v27 = vpop.f32.mrf.mxu0  ;;  %v382_v28 = vpop.f32.mrf.mxu1 }
  0xe0   : > { %735 = vpow2.f32 %v406_v21  ;;  %v402_v29 = vmul.f32 1.442695, %v394_v23  ;;  %v410_v30 = vmul.f32 1.442695, %v398_v24  ;;  %v367_v31 = vadd.f32 %v620_v8, %v366_v27 }
  0xe1   : > { %737 = vpow2.f32 %v414_v22  ;;  %v397_v32 = vsub.f32 0.0, %v375_v25  ;;  %v401_v33 = vsub.f32 0.0, %v391_v26  ;;  %v383_v34 = vadd.f32 %v620_v8, %v382_v28 }
  0xe2   : > { %739 = vpow2.f32 %v402_v29  ;;  %v395_v35 = vsub.f32 0.0, %v367_v31 }
  0xe3   : > { %741 = vpow2.f32 %v410_v30  ;;  %v408_v36 = vmul.f32 1.442695, %v397_v32  ;;  %v416_v37 = vmul.f32 1.442695, %v401_v33  ;;  %v399_v38 = vsub.f32 0.0, %v383_v34 }
  0xe4   : > { %v404_v39 = vmul.f32 1.442695, %v395_v35 }
  0xe5   : > { %743 = vpow2.f32 %v408_v36  ;;  %v412_v40 = vmul.f32 1.442695, %v399_v38 }
  0xe6   : > { %745 = vpow2.f32 %v416_v37 }
  0xe7   : > { %747 = vpow2.f32 %v404_v39 }
  0xe8   : > { %749 = vpow2.f32 %v412_v40 }
  0xed   : > { %v736_v41 = vpop.eup %735 }
  0xee   : > { %v738_v42 = vpop.eup %737  ;;  %v420_v43 = vadd.f32 1.0, %v736_v41 }
  0xef   : > { %v740_v44 = vpop.eup %739  ;;  %v424_v45 = vadd.f32 1.0, %v738_v42 }
  0xf0   : > { %v742_v46 = vpop.eup %741  ;;  %v418_v47 = vadd.f32 1.0, %v740_v44  ;;  %751 = vrcp.f32 %v420_v43 }
  0xf1   : > { %v422_v48 = vadd.f32 1.0, %v742_v46  ;;  %753 = vrcp.f32 %v424_v45 }
  0xf2   : > { %v744_v49 = vpop.eup %743  ;;  %755 = vrcp.f32 %v418_v47 }
  0xf3   : > { %v746_v50 = vpop.eup %745  ;;  %v421_v51 = vadd.f32 1.0, %v744_v49  ;;  %757 = vrcp.f32 %v422_v48 }
  0xf4   : > { %v748_v52 = vpop.eup %747  ;;  %v425_v53 = vadd.f32 1.0, %v746_v50 }
  0xf5   : > { %v750_v54 = vpop.eup %749  ;;  %759 = vrcp.f32 %v421_v51  ;;  %v419_v55 = vadd.f32 1.0, %v748_v52 }
  0xf6   : > { %761 = vrcp.f32 %v425_v53  ;;  %v423_v56 = vadd.f32 1.0, %v750_v54 }
  0xf7   : > { %763 = vrcp.f32 %v419_v55 }
  0xf8   : > { %765 = vrcp.f32 %v423_v56 }
  0xfd   : > { %v752_v57 = vpop.eup %751 }
  0xfe   : > { %v754_v58 = vpop.eup %753  ;;  %v436_v63 = vmul.f32 %v752_v57, %v849_v11 }
  0xff   : > { %v756_v59 = vpop.eup %755  ;;  %v440_v2 = vmul.f32 %v754_v58, %v851_v12 }
 0x100   : > { %v758_v60 = vpop.eup %757  ;;  %v434_v5 = vmul.f32 %v756_v59, %v855_v17 }
 0x101   : > { %v438_v8 = vmul.f32 %v758_v60, %v857_v18 }
 0x102   : > { %v760_v61 = vpop.eup %759 }
 0x103   : > { %v762_v62 = vpop.eup %761  ;;  %v437_v0 = vmul.f32 %v760_v61, %v375_v25 }
 0x104   : > { %v764_v1 = vpop.eup %763  ;;  %v441_v3 = vmul.f32 %v762_v62, %v391_v26 }
 0x105   : > { %v766_v4 = vpop.eup %765  ;;  %v660_v6 = vpack.c.bf16 %v437_v0, %v436_v63  ;;  %v435_v7 = vmul.f32 %v764_v1, %v367_v31 }
 0x106   : > { %v670_v9 = vpack.c.bf16 %v441_v3, %v440_v2  ;;  %v439_v10 = vmul.f32 %v766_v4, %v383_v34 }
 0x107   : > { %672 = vst [vmem:[%s254_s30 + $0x8] sm:$0xff] %v660_v6   ;;  %v655_v11 = vpack.c.bf16 %v435_v7, %v434_v5 }
 0x108   : > { %674 = vst [vmem:[%s254_s30 + $0x18] sm:$0xff] %v670_v9   ;;  %v665_v13 = vpack.c.bf16 %v439_v10, %v438_v8 }
 0x109   : > { %656 = vst [vmem:[%s254_s30] sm:$0xff] %v655_v11  }
 0x10a   : > { %673 = vst [vmem:[%s254_s30 + $0x10] sm:$0xff] %v665_v13  }
 0x10b PF: > { %s13_s14 = sadd.s32 1, %s789_s14   ;;  %s883_s12 = smov %s785_s13 }
 0x10c   : > { %p10_p5 = scmp.ge.s32.totalorder %s13_s14, 4   ;;  %s884_s13 = smov %s886_s15 }
 0x10e   :  { %12 = sbr.rel (!%p10_p5) target bundleno = 2 (0x2), region = 68 }

</bundles_post_ra>
